<compile_context>
chip_gen: v7x
topology: tpu7x:2x2x1
jax: 0.10.0
libtpu: 0.0.40
codegen_flags: <defaults>
</compile_context>

<pallas_src>
import jax
import jax.numpy as jnp
from jax.experimental import pallas as pl
from jax.experimental.pallas import tpu as pltpu


_LANE = 128
_SMALL_FASTPATH_ELEMS = 1024      # below this, plain XLA add wins on overhead
_TARGET_TILE_BYTES = 2 << 20      # ~2 MiB per block per buffer


def _add_one_kernel(x_ref, o_ref):
    # Elementwise hot path: output = input + 1
    o_ref[...] = x_ref[...] + jnp.asarray(1, dtype=x_ref.dtype)


def _sublane_multiple(dtype) -> int:
    # f32 -> 8, bf16 -> 16, int8/fp8 -> 32 (packed sublanes).
    itemsize = jnp.dtype(dtype).itemsize
    return max(8, 32 // max(itemsize, 1))


def _pallas_add_one_2d(x2: jax.Array, tile_rows: int) -> jax.Array:
    rows, cols = x2.shape
    itemsize = jnp.dtype(x2.dtype).itemsize
    n_tiles = pl.cdiv(rows, tile_rows)
    return pl.pallas_call(
        _add_one_kernel,
        out_shape=jax.ShapeDtypeStruct((rows, cols), x2.dtype),
        grid=(n_tiles,),
        in_specs=[pl.BlockSpec((tile_rows, cols), lambda i: (i, 0))],
        out_specs=pl.BlockSpec((tile_rows, cols), lambda i: (i, 0)),
        input_output_aliases={0: 0},
        compiler_params=pltpu.CompilerParams(
            dimension_semantics=("parallel",),
        ),
        cost_estimate=pl.CostEstimate(
            flops=rows * cols,
            transcendentals=0,
            bytes_accessed=2 * rows * cols * itemsize,
        ),
    )(x2)


def tudui_forward(x: jax.Array) -> jax.Array:
    """Pallas equivalent of Tudui.forward(input) = input + 1 (any shape/dtype)."""
    x = jnp.asarray(x)
    orig_shape = x.shape
    n = x.size
    one = jnp.asarray(1, dtype=x.dtype)

    # Scalar / tiny-input fast path: custom-call setup overhead dominates here.
    if n <= _SMALL_FASTPATH_ELEMS:
        return x + one

    dtype = x.dtype
    itemsize = jnp.dtype(dtype).itemsize
    sub = _sublane_multiple(dtype)

    # Lane-dense slab: wide lane dim (multiple of 128) for unmasked full-vreg stores.
    cols = 1024 if n >= 1024 * sub else _LANE
    chunk = cols * sub
    padded = ((n + chunk - 1) // chunk) * chunk

    flat = x.reshape(-1)
    if padded != n:
        flat = jnp.pad(flat, (0, padded - n))
    rows = padded // cols
    x2 = flat.reshape(rows, cols)

    # ~2 MiB tiles (rounded to the sublane multiple); grid handles partial last block.
    tile_rows = (_TARGET_TILE_BYTES // (cols * itemsize)) // sub * sub
    tile_rows = max(sub, min(rows, tile_rows))

    out2 = _pallas_add_one_2d(x2, tile_rows)
    return out2.reshape(-1)[:n].reshape(orig_shape)


if __name__ == "__main__":
    # Mirror the PyTorch script: x = torch.tensor(1.0); output = tudui.forward(x)
    x_scalar = jnp.asarray(1.0, dtype=jnp.float32)
    out_scalar = jax.block_until_ready(tudui_forward(x_scalar))
    assert out_scalar.shape == ()
    assert jnp.allclose(out_scalar, 2.0), out_scalar

    # Small tensor input (exercises the single-tile Pallas path).
    key = jax.random.PRNGKey(0)
    x = jax.random.normal(key, (2, 4, 16, 16), dtype=jnp.float32)
    out = jax.block_until_ready(tudui_forward(x))
    assert out.shape == x.shape
    assert jnp.allclose(out, x + 1.0), "mismatch vs reference (small tensor)"

    # Larger, non-lane-aligned input: exercises lane-dense padding, multi-tile
    # pipelined grid, and the masked partial last block.
    x_large = jax.random.normal(jax.random.PRNGKey(0), (512, 2053), dtype=jnp.float32)
    out_large = jax.block_until_ready(tudui_forward(x_large))
    assert out_large.shape == x_large.shape
    assert jnp.allclose(out_large, x_large + 1.0), "mismatch vs reference (large tensor)"

    print("KERNEL_OK")
</pallas_src>

<mosaic_0001>
module attributes {stable_mosaic.version = 11 : i64} {
  func.func @_add_one_kernel(%arg0: i32, %arg1: memref<16x128xf32, #tpu.memory_space<vmem>>, %arg2: memref<16x128xf32, #tpu.memory_space<vmem>>) attributes {dimension_semantics = [#tpu.dimension_semantics<parallel>], iteration_bounds = array<i64: 1>, scalar_prefetch = 0 : i64, scratch_operands = 0 : i64, tpu.core_type = #tpu.core_type<tc>, window_params = [{transform_indices = @transform_0, window_bounds = array<i64: 16, 128>}, {transform_indices = @transform_1, window_bounds = array<i64: 16, 128>}]} {
    %c0 = arith.constant 0 : index
    %c0_0 = arith.constant 0 : index
    %0 = vector.load %arg1[%c0, %c0_0] : memref<16x128xf32, #tpu.memory_space<vmem>>, vector<16x128xf32>
    %cst = arith.constant 1.000000e+00 : f32
    %1 = vector.broadcast %cst : f32 to vector<16x128xf32>
    %2 = arith.addf %0, %1 : vector<16x128xf32>
    %c0_1 = arith.constant 0 : index
    %c0_2 = arith.constant 0 : index
    %3 = vector.load %arg2[%c0_1, %c0_2] : memref<16x128xf32, #tpu.memory_space<vmem>>, vector<16x128xf32>
    tpu.vector_store %arg2[%c0_1, %c0_2], %2 {strides = array<i32>} : memref<16x128xf32, #tpu.memory_space<vmem>>, vector<16x128xf32>,
    return
  }
  func.func @transform_0(%arg0: i32) -> (i32, i32) {
    %c0_i32 = arith.constant 0 : i32
    %c0_i32_0 = arith.constant 0 : i32
    return %arg0, %c0_i32 : i32, i32
  }
  func.func @transform_1(%arg0: i32) -> (i32, i32) {
    %c0_i32 = arith.constant 0 : i32
    %c0_i32_0 = arith.constant 0 : i32
    return %arg0, %c0_i32 : i32, i32
  }
}

</mosaic_0001>

<bundles_post_ra>
// kernel: tpu_custom_call.1
= control target key start
LH: loop header
LB: loop body
LE: loop exit
PB: predicated region body
PF: predicated region fallthrough
CT: control target
= control target key end

     0   :  { %6 = vsyncpa [#allocation3], 0  ;;  %s136_s0 = inlined_call_operand.hbm [shape: f32[16,128], index: 0, kind: input, shape index: {}, may-alias: {0,1}]   ;;  %s137_s1 = inlined_call_operand.hbm [shape: f32[16,128], index: 1, kind: output, shape index: {}, may-alias: {0,1}]  }
   0x1   :  { %7 = vsyncpa [#allocation4], 0  ;;  %s98_s6 = smov [#allocation2]   ;;  %s50_s10 = scalar_lea.hbm %s136_s0, 256 }
   0x2   :  { %s13_s7 = sshll.u32 %s98_s6, 4  ;;  %p51_p0 = scmp.ne.s32.totalorder %s136_s0, %s50_s10  ;;  %s14_s7 = int_to_ptr.vmem [resolvable:$true] %s13_s7 }
   0x3   :  { %p54_p1 = scmp.lt.u32.totalorder %s50_s10, %s136_s0 }
   0x5   :  { %p56_p2 = pnand %p54_p1, %p51_p0 }
   0x7   :  { %59 = shalt.err (!%p56_p2)
}
   0x8   :  { %s60_s15 = scalar_lea.vmem %s14_s7, 256  ;;  %p65_p4 = scmp.lt.s32.totalorder %s14_s7, %s14_s7 }
   0x9   :  { %p61_p3 = scmp.ne.s32.totalorder %s14_s7, %s60_s15  ;;  %p66_p5 = scmp.lt.s32.totalorder %s60_s15, %s60_s15 }
   0xb   :  { %p67_p6 = por %p66_p5, %p65_p4 }
   0xd   :  { %p68_p7 = pnand %p67_p6, %p61_p3 }
   0xf   :  { %71 = shalt.err (!%p68_p7)
}
  0x10   :  { %s99_s16 = smov 128   ;;  %s100_s17 = smov 8  }
  0x11   :  { %19 = dma.hbm_to_vmem [thread:$0]  %s136_s0, 256, %s14_s7, [#allocation3], %s99_s16, %s99_s16, %s100_s17  }
  0x12   :  { %94 = dma.done.wait [#allocation3], 256  }
  0x13   :  { %95 = vsyncadd [#allocation3], 4294967040  ;;  %s101_s20 = smov [#allocation5]   ;;  %v23_v0 = vld [vmem:[#allocation2] sm:$0xff]  ;;  %v24_v1 = vld [vmem:[#allocation2 + $0x8] sm:$0xff] }
  0x14   :  { %s34_s21 = sshll.u32 %s101_s20, 4  ;;  %v25_v2 = vadd.f32 1.0, %v23_v0  ;;  %v26_v3 = vadd.f32 1.0, %v24_v1  ;;  %s35_s21 = int_to_ptr.vmem [resolvable:$true] %s34_s21 }
  0x15   :  { %s72_s22 = scalar_lea.vmem %s35_s21, 256  ;;  %p77_p9 = scmp.lt.s32.totalorder %s35_s21, %s35_s21 }
  0x16   :  { %27 = vst [vmem:[#allocation5] sm:$0xff] %v25_v2  ;;  %28 = vst [vmem:[#allocation5 + $0x8] sm:$0xff] %v26_v3  ;;  %p73_p8 = scmp.ne.s32.totalorder %s35_s21, %s72_s22  ;;  %p78_p10 = scmp.lt.s32.totalorder %s72_s22, %s72_s22 }
  0x18   :  { %p79_p11 = por %p78_p10, %p77_p9 }
  0x1a   :  { %p80_p12 = pnand %p79_p11, %p73_p8 }
  0x1c   :  { %83 = shalt.err (!%p80_p12)
}
  0x1d   :  { %s84_s24 = scalar_lea.hbm %s137_s1, 256 }
  0x1e   :  { %p85_p13 = scmp.ne.s32.totalorder %s137_s1, %s84_s24  ;;  %p88_p0 = scmp.lt.u32.totalorder %s84_s24, %s137_s1 }
  0x20   :  { %p90_p1 = pnand %p88_p0, %p85_p13 }
  0x22   :  { %93 = shalt.err (!%p90_p1)
}
  0x23   :  { %40 = dma.vmem_to_hbm [thread:$0]  %s35_s21, 256, %s137_s1, [#allocation4], %s99_s16, %s99_s16, %s100_s17  }
  0x24   :  { %96 = dma.done.wait [#allocation4], 256  }
  0x25   :  { %97 = vsyncadd [#allocation4], 4294967040 }
  0x26   :  { %44 = vsyncpa [#allocation3], 1 }
  0x27   :  { %45 = vsyncpa [#allocation4], 1 }

</bundles_post_ra>
